<compile_context>
chip_gen: v6e
topology: v6e:2x2x1
jax: 0.10.0
libtpu: 0.0.40
codegen_flags: <defaults>
</compile_context>

<pallas_src>
import numpy as np
import jax
import jax.numpy as jnp
from jax.experimental import pallas as pl
from jax.experimental.pallas import tpu as pltpu

# ---- hyperparameters (stand-ins for args.basis_*) ----
BASIS_ORDER = 4      # args.basis_order  -> MLP input dim = 4 * order = 16
BASIS_HIDDEN = 32    # args.basis_hidden
BASIS_MLP = 2        # args.basis_mlp (number of hidden layers in ReluMLP; definition assumed)
BASIS_OUT = 8        # args.basis_out
LRELU_SLOPE = 0.01   # args.lrelu_slope
MAX_TILE = 4096      # points per grid step (sweepable 2048-8192; ~230 B/row double-buffered)


def _leaky_relu(x, slope):
    return jnp.where(x >= 0, x, slope * x)


# ---------------- constant matrices (built once, passed untiled) ----------------
def _freq_matrix():
    # big^T = F @ xy^T, rows = [x*2^0..x*2^{o-1}, y*2^0..y*2^{o-1}] * (pi/2)
    f = np.zeros((2 * BASIS_ORDER, 2), np.float32)
    for i in range(BASIS_ORDER):
        f[i, 0] = 0.5 * np.pi * (2.0 ** i)
        f[BASIS_ORDER + i, 1] = 0.5 * np.pi * (2.0 ** i)
    return jnp.asarray(f)


def _selector_matrix():
    # (3, 3*OUT) block-diagonal 0/1 selector: out[c] = sum_k prod[c*OUT+k]
    s = np.zeros((3, 3 * BASIS_OUT), np.float32)
    for c in range(3):
        s[c, c * BASIS_OUT:(c + 1) * BASIS_OUT] = 1.0
    return jnp.asarray(s)


def _prep_params(params):
    """Transpose + split/tile weights for the feature-major kernel (constant folded)."""
    w0, b0, w1, b1, w2, b2 = params
    two_order = 2 * BASIS_ORDER
    w0s_t = jnp.transpose(w0[:two_order])                 # (H, 2*order)  acts on sin(big)
    w0c_t = jnp.transpose(w0[two_order:])                 # (H, 2*order)  acts on cos(big)
    b0_t = jnp.reshape(b0, (-1, 1))                       # (H, 1)
    w1_t = jnp.transpose(w1)                              # (H, H)
    b1_t = jnp.reshape(b1, (-1, 1))                       # (H, 1)
    w2_3t = jnp.transpose(jnp.tile(w2, (1, 3)))           # (3*OUT, H)  basis repeated 3x
    b2_3t = jnp.reshape(jnp.tile(b2, (1, 3)), (-1, 1))    # (3*OUT, 1)
    return w0s_t, w0c_t, b0_t, w1_t, b1_t, w2_3t, b2_3t


# ---------------- kernel (feature-major: points on lanes) ----------------
def basis_kernel(xy_ref, coeff_ref, f_ref, sel_ref,
                 w0s_ref, w0c_ref, b0_ref, w1_ref, b1_ref, w23_ref, b23_ref,
                 out_ref):
    # positional encoding as a tiny matmul: big = F @ xy  -> (2*order, T)
    big = jnp.dot(f_ref[...], xy_ref[...], preferred_element_type=jnp.float32)

    # hidden layer 0: w0 split into sin/cos halves, no concat
    h = (jnp.dot(w0s_ref[...], jnp.sin(big), preferred_element_type=jnp.float32)
         + jnp.dot(w0c_ref[...], jnp.cos(big), preferred_element_type=jnp.float32)
         + b0_ref[...])
    h = _leaky_relu(h, LRELU_SLOPE)

    # hidden layer 1
    h = _leaky_relu(
        jnp.dot(w1_ref[...], h, preferred_element_type=jnp.float32) + b1_ref[...],
        LRELU_SLOPE)

    # output layer, tiled 3x along the output dim -> (3*OUT, T)
    basis3 = jnp.tanh(
        jnp.dot(w23_ref[...], h, preferred_element_type=jnp.float32) + b23_ref[...])

    # coeff epilogue: tanh(coeff) * basis, per-channel sum via selector matmul
    # TODO(synk): if the producer can emit coeff post-tanh, drop this tanh (EUP relief).
    prod = jnp.tanh(coeff_ref[...]) * basis3               # (3*OUT, T)
    out_ref[...] = jnp.dot(sel_ref[...], prod,
                           preferred_element_type=jnp.float32)   # (3, T) lane-dense


# ---------------- wrapper ----------------
def _choose_tile(n, max_tile=MAX_TILE):
    """Largest tile <= max_tile; keep >=2 grid steps when possible (v7x megacore)."""
    if n >= 2 * max_tile:
        return max_tile
    half = (n + 1) // 2
    t = ((half + 127) // 128) * 128
    return min(max(t, 128), max_tile)


def basis_mlp_pallas(xy_t, coeff_t, params):
    """xy_t: (2, N) f32, coeff_t: (3*OUT, N) f32 -> (3, N) f32 (feature-major)."""
    N = xy_t.shape[1]
    tile = _choose_tile(N)
    n_pad = pl.cdiv(N, tile) * tile
    if n_pad != N:
        xy_t = jnp.pad(xy_t, ((0, 0), (0, n_pad - N)))
        coeff_t = jnp.pad(coeff_t, ((0, 0), (0, n_pad - N)))
    grid = (n_pad // tile,)

    w0s_t, w0c_t, b0_t, w1_t, b1_t, w2_3t, b2_3t = _prep_params(params)
    consts = (_freq_matrix(), _selector_matrix(),
              w0s_t, w0c_t, b0_t, w1_t, b1_t, w2_3t, b2_3t)

    def fullspec(arr):
        nd = arr.ndim
        return pl.BlockSpec(arr.shape, lambda i, _nd=nd: (0,) * _nd)

    out = pl.pallas_call(
        basis_kernel,
        out_shape=jax.ShapeDtypeStruct((3, n_pad), jnp.float32),
        grid_spec=pltpu.PrefetchScalarGridSpec(
            num_scalar_prefetch=0,
            grid=grid,
            in_specs=[pl.BlockSpec((2, tile), lambda i: (0, i)),
                      pl.BlockSpec((3 * BASIS_OUT, tile), lambda i: (0, i))]
                     + [fullspec(a) for a in consts],
            out_specs=pl.BlockSpec((3, tile), lambda i: (0, i)),
        ),
        compiler_params=pltpu.CompilerParams(dimension_semantics=("parallel",)),
    )(xy_t, coeff_t, *consts)
    return out[:, :N]


# ---------------- plain-JAX glue: get_viewing_angle ----------------
def get_viewing_angle(ref_rT, ref_t, center, fx, fy, px, py, ref_coords, planes):
    camera = ref_rT.T @ center + ref_t                        # (3,)
    coords = jnp.transpose(ref_coords, (0, 2, 1))             # (n, 2, sel)
    coords = jnp.concatenate([coords, jnp.ones_like(coords[:, :1])], axis=1)  # (n, 3, sel)
    xyz = coords * planes[:, None, None]
    K = jnp.array([[fx, 0.0, px], [0.0, fy, py], [0.0, 0.0, 1.0]], jnp.float32)
    ki = jnp.linalg.inv(K)
    xyz = jnp.einsum('ij,njs->nis', ki, xyz)                  # (n, 3, sel)
    d = xyz - camera[None, :, None]
    inv_view = d / (jnp.linalg.norm(d, axis=1, keepdims=True) + 1e-7)
    view = jnp.transpose(inv_view, (0, 2, 1))                 # (n, sel, 3)
    return view[:, :, None]                                    # (n, sel, 1, 3)


def basis_forward(ref_rT, ref_t, center, fx, fy, px, py, ref_coords, planes, coeff, params):
    vi = get_viewing_angle(ref_rT, ref_t, center, fx, fy, px, py, ref_coords, planes)
    n, sel = vi.shape[:2]
    N = n * sel
    # layout plumbing: feature-major / lane-dense kernel inputs
    xy_t = jnp.transpose(vi[:, :, 0, :2].reshape(N, 2)).astype(jnp.float32)        # (2, N)
    coeff_t = jnp.transpose(coeff.reshape(N, 3 * BASIS_OUT)).astype(jnp.float32)   # (3*OUT, N)
    illum = basis_mlp_pallas(xy_t, coeff_t, params)            # (3, N)
    illum = illum.reshape(3, n, sel)
    return jnp.transpose(illum, (1, 0, 2))[..., None]          # (n, 3, sel, 1)


# ---------------- pure-JAX reference (point-major, mirrors the torch module) ----------------
def basis_reference(xy, coeff_flat, params):
    w0, b0, w1, b1, w2, b2 = params
    big = jnp.concatenate(
        [xy[:, 0:1] * (2.0 ** i) for i in range(BASIS_ORDER)]
        + [xy[:, 1:2] * (2.0 ** i) for i in range(BASIS_ORDER)], axis=-1)
    big = 0.5 * np.pi * big
    enc = jnp.concatenate([jnp.sin(big), jnp.cos(big)], axis=-1)
    h = jax.nn.leaky_relu(enc @ w0 + b0, LRELU_SLOPE)
    h = jax.nn.leaky_relu(h @ w1 + b1, LRELU_SLOPE)
    basis = jnp.tanh(h @ w2 + b2)
    coeff = jnp.tanh(coeff_flat).reshape(-1, 3, BASIS_OUT)
    return jnp.sum(coeff * basis[:, None, :], axis=-1)


if __name__ == "__main__":
    key = jax.random.PRNGKey(0)
    ks = jax.random.split(key, 12)

    # deterministic parameter init (ReluMLP: 16 -> 32 -> 32 -> 8)
    in_dim = 4 * BASIS_ORDER
    w0 = 0.2 * jax.random.normal(ks[0], (in_dim, BASIS_HIDDEN), jnp.float32)
    b0 = 0.1 * jax.random.normal(ks[1], (1, BASIS_HIDDEN), jnp.float32)
    w1 = 0.2 * jax.random.normal(ks[2], (BASIS_HIDDEN, BASIS_HIDDEN), jnp.float32)
    b1 = 0.1 * jax.random.normal(ks[3], (1, BASIS_HIDDEN), jnp.float32)
    w2 = 0.2 * jax.random.normal(ks[4], (BASIS_HIDDEN, BASIS_OUT), jnp.float32)
    b2 = 0.1 * jax.random.normal(ks[5], (1, BASIS_OUT), jnp.float32)
    params = (w0, b0, w1, b1, w2, b2)

    # small synthetic scene: n planes, sel points per plane
    n, sel = 2, 256
    ref_rT = jnp.eye(3, dtype=jnp.float32)
    ref_t = 0.1 * jax.random.normal(ks[6], (3,), jnp.float32)
    center = 0.1 * jax.random.normal(ks[7], (3,), jnp.float32)
    fx = fy = 200.0
    px = py = 8.0
    ref_coords = 16.0 * jax.random.uniform(ks[8], (n, sel, 2), jnp.float32)   # pixel coords
    planes = jnp.array([1.0, 2.0], jnp.float32)
    coeff = jax.random.normal(ks[9], (n, sel, 1, 3 * BASIS_OUT), jnp.float32)

    illum = basis_forward(ref_rT, ref_t, center, fx, fy, px, py,
                          ref_coords, planes, coeff, params)
    illum = jax.block_until_ready(illum)
    assert illum.shape == (n, 3, sel, 1)

    # sanity check against pure-JAX reference
    vi = get_viewing_angle(ref_rT, ref_t, center, fx, fy, px, py, ref_coords, planes)
    xy = vi[:, :, 0, :2].reshape(n * sel, 2)
    ref = basis_reference(xy, coeff.reshape(n * sel, 3 * BASIS_OUT), params)
    ref = jnp.transpose(ref.reshape(n, sel, 1, 3), (0, 3, 1, 2))
    np.testing.assert_allclose(np.asarray(illum), np.asarray(ref), atol=2e-3, rtol=2e-3)

    print("KERNEL_OK")
</pallas_src>

<mosaic_0001>
module attributes {stable_mosaic.version = 11 : i64} {
  func.func @basis_kernel(%arg0: i32, %arg1: memref<2x256xf32, #tpu.memory_space<vmem>>, %arg2: memref<24x256xf32, #tpu.memory_space<vmem>>, %arg3: memref<8x2xf32, #tpu.memory_space<vmem>>, %arg4: memref<3x24xf32, #tpu.memory_space<vmem>>, %arg5: memref<32x8xf32, #tpu.memory_space<vmem>>, %arg6: memref<32x8xf32, #tpu.memory_space<vmem>>, %arg7: memref<32x1xf32, #tpu.memory_space<vmem>>, %arg8: memref<32x32xf32, #tpu.memory_space<vmem>>, %arg9: memref<32x1xf32, #tpu.memory_space<vmem>>, %arg10: memref<24x32xf32, #tpu.memory_space<vmem>>, %arg11: memref<24x1xf32, #tpu.memory_space<vmem>>, %arg12: memref<3x256xf32, #tpu.memory_space<vmem>>) attributes {dimension_semantics = [#tpu.dimension_semantics<parallel>], iteration_bounds = array<i64: 2>, scalar_prefetch = 0 : i64, scratch_operands = 0 : i64, tpu.core_type = #tpu.core_type<tc>, window_params = [{transform_indices = @transform_0, window_bounds = array<i64: 2, 256>}, {transform_indices = @transform_1, window_bounds = array<i64: 24, 256>}, {pipeline_mode = #tpu.pipeline_mode<synchronous>, transform_indices = @transform_2, window_bounds = array<i64: 8, 2>}, {pipeline_mode = #tpu.pipeline_mode<synchronous>, transform_indices = @transform_3, window_bounds = array<i64: 3, 24>}, {pipeline_mode = #tpu.pipeline_mode<synchronous>, transform_indices = @transform_4, window_bounds = array<i64: 32, 8>}, {pipeline_mode = #tpu.pipeline_mode<synchronous>, transform_indices = @transform_5, window_bounds = array<i64: 32, 8>}, {pipeline_mode = #tpu.pipeline_mode<synchronous>, transform_indices = @transform_6, window_bounds = array<i64: 32, 1>}, {pipeline_mode = #tpu.pipeline_mode<synchronous>, transform_indices = @transform_7, window_bounds = array<i64: 32, 32>}, {pipeline_mode = #tpu.pipeline_mode<synchronous>, transform_indices = @transform_8, window_bounds = array<i64: 32, 1>}, {pipeline_mode = #tpu.pipeline_mode<synchronous>, transform_indices = @transform_9, window_bounds = array<i64: 24, 32>}, {pipeline_mode = #tpu.pipeline_mode<synchronous>, transform_indices = @transform_10, window_bounds = array<i64: 24, 1>}, {transform_indices = @transform_11, window_bounds = array<i64: 3, 256>}]} {
    %c0 = arith.constant 0 : index
    %c0_0 = arith.constant 0 : index
    %0 = vector.load %arg3[%c0, %c0_0] : memref<8x2xf32, #tpu.memory_space<vmem>>, vector<8x2xf32>
    %c0_1 = arith.constant 0 : index
    %c0_2 = arith.constant 0 : index
    %1 = vector.load %arg1[%c0_1, %c0_2] : memref<2x256xf32, #tpu.memory_space<vmem>>, vector<2x256xf32>
    %cst = arith.constant dense<0.000000e+00> : vector<8x256xf32>
    %2 = tpu.matmul %0, %1, %cst {dimension_numbers = #tpu.dot_dimension_numbers<[1], [0], [0], [1], [0, 0, 1, 1], [], []>} : vector<8x2xf32>, vector<2x256xf32>, vector<8x256xf32> -> vector<8x256xf32>
    %c0_3 = arith.constant 0 : index
    %c0_4 = arith.constant 0 : index
    %3 = vector.load %arg5[%c0_3, %c0_4] : memref<32x8xf32, #tpu.memory_space<vmem>>, vector<32x8xf32>
    %4 = math.sin %2 : vector<8x256xf32>
    %cst_5 = arith.constant dense<0.000000e+00> : vector<32x256xf32>
    %5 = tpu.matmul %3, %4, %cst_5 {dimension_numbers = #tpu.dot_dimension_numbers<[1], [0], [0], [1], [0, 0, 1, 1], [], []>} : vector<32x8xf32>, vector<8x256xf32>, vector<32x256xf32> -> vector<32x256xf32>
    %c0_6 = arith.constant 0 : index
    %c0_7 = arith.constant 0 : index
    %6 = vector.load %arg6[%c0_6, %c0_7] : memref<32x8xf32, #tpu.memory_space<vmem>>, vector<32x8xf32>
    %7 = math.cos %2 : vector<8x256xf32>
    %cst_8 = arith.constant dense<0.000000e+00> : vector<32x256xf32>
    %8 = tpu.matmul %6, %7, %cst_8 {dimension_numbers = #tpu.dot_dimension_numbers<[1], [0], [0], [1], [0, 0, 1, 1], [], []>} : vector<32x8xf32>, vector<8x256xf32>, vector<32x256xf32> -> vector<32x256xf32>
    %9 = arith.addf %5, %8 : vector<32x256xf32>
    %c0_9 = arith.constant 0 : index
    %c0_10 = arith.constant 0 : index
    %10 = vector.load %arg7[%c0_9, %c0_10] : memref<32x1xf32, #tpu.memory_space<vmem>>, vector<32x1xf32>
    %11 = vector.broadcast %10 : vector<32x1xf32> to vector<32x256xf32>
    %12 = arith.addf %9, %11 : vector<32x256xf32>
    %cst_11 = arith.constant 0.000000e+00 : f32
    %13 = vector.broadcast %cst_11 : f32 to vector<32x256xf32>
    %14 = arith.cmpf oge, %12, %13 : vector<32x256xf32>
    %cst_12 = arith.constant 0.00999999977 : f32
    %15 = vector.broadcast %cst_12 : f32 to vector<32x256xf32>
    %16 = arith.mulf %15, %12 : vector<32x256xf32>
    %17 = arith.select %14, %12, %16 : vector<32x256xi1>, vector<32x256xf32>
    %c0_13 = arith.constant 0 : index
    %c0_14 = arith.constant 0 : index
    %18 = vector.load %arg8[%c0_13, %c0_14] : memref<32x32xf32, #tpu.memory_space<vmem>>, vector<32x32xf32>
    %cst_15 = arith.constant dense<0.000000e+00> : vector<32x256xf32>
    %19 = tpu.matmul %18, %17, %cst_15 {dimension_numbers = #tpu.dot_dimension_numbers<[1], [0], [0], [1], [0, 0, 1, 1], [], []>} : vector<32x32xf32>, vector<32x256xf32>, vector<32x256xf32> -> vector<32x256xf32>
    %c0_16 = arith.constant 0 : index
    %c0_17 = arith.constant 0 : index
    %20 = vector.load %arg9[%c0_16, %c0_17] : memref<32x1xf32, #tpu.memory_space<vmem>>, vector<32x1xf32>
    %21 = vector.broadcast %20 : vector<32x1xf32> to vector<32x256xf32>
    %22 = arith.addf %19, %21 : vector<32x256xf32>
    %cst_18 = arith.constant 0.000000e+00 : f32
    %23 = vector.broadcast %cst_18 : f32 to vector<32x256xf32>
    %24 = arith.cmpf oge, %22, %23 : vector<32x256xf32>
    %cst_19 = arith.constant 0.00999999977 : f32
    %25 = vector.broadcast %cst_19 : f32 to vector<32x256xf32>
    %26 = arith.mulf %25, %22 : vector<32x256xf32>
    %27 = arith.select %24, %22, %26 : vector<32x256xi1>, vector<32x256xf32>
    %c0_20 = arith.constant 0 : index
    %c0_21 = arith.constant 0 : index
    %28 = vector.load %arg10[%c0_20, %c0_21] : memref<24x32xf32, #tpu.memory_space<vmem>>, vector<24x32xf32>
    %cst_22 = arith.constant dense<0.000000e+00> : vector<24x256xf32>
    %29 = tpu.matmul %28, %27, %cst_22 {dimension_numbers = #tpu.dot_dimension_numbers<[1], [0], [0], [1], [0, 0, 1, 1], [], []>} : vector<24x32xf32>, vector<32x256xf32>, vector<24x256xf32> -> vector<24x256xf32>
    %c0_23 = arith.constant 0 : index
    %c0_24 = arith.constant 0 : index
    %30 = vector.load %arg11[%c0_23, %c0_24] : memref<24x1xf32, #tpu.memory_space<vmem>>, vector<24x1xf32>
    %31 = vector.broadcast %30 : vector<24x1xf32> to vector<24x256xf32>
    %32 = arith.addf %29, %31 : vector<24x256xf32>
    %33 = math.tanh %32 : vector<24x256xf32>
    %c0_25 = arith.constant 0 : index
    %c0_26 = arith.constant 0 : index
    %34 = vector.load %arg2[%c0_25, %c0_26] : memref<24x256xf32, #tpu.memory_space<vmem>>, vector<24x256xf32>
    %35 = math.tanh %34 : vector<24x256xf32>
    %36 = arith.mulf %35, %33 : vector<24x256xf32>
    %c0_27 = arith.constant 0 : index
    %c0_28 = arith.constant 0 : index
    %37 = vector.load %arg4[%c0_27, %c0_28] : memref<3x24xf32, #tpu.memory_space<vmem>>, vector<3x24xf32>
    %cst_29 = arith.constant dense<0.000000e+00> : vector<3x256xf32>
    %38 = tpu.matmul %37, %36, %cst_29 {dimension_numbers = #tpu.dot_dimension_numbers<[1], [0], [0], [1], [0, 0, 1, 1], [], []>} : vector<3x24xf32>, vector<24x256xf32>, vector<3x256xf32> -> vector<3x256xf32>
    %c0_30 = arith.constant 0 : index
    %c0_31 = arith.constant 0 : index
    %39 = vector.load %arg12[%c0_30, %c0_31] : memref<3x256xf32, #tpu.memory_space<vmem>>, vector<3x256xf32>
    tpu.vector_store %arg12[%c0_30, %c0_31], %38 {strides = array<i32>} : memref<3x256xf32, #tpu.memory_space<vmem>>, vector<3x256xf32>,
    return
  }
  func.func @transform_0(%arg0: i32) -> (i32, i32) {
    %c0_i32 = arith.constant 0 : i32
    %c0_i32_0 = arith.constant 0 : i32
    return %c0_i32, %arg0 : i32, i32
  }
  func.func @transform_1(%arg0: i32) -> (i32, i32) {
    %c0_i32 = arith.constant 0 : i32
    %c0_i32_0 = arith.constant 0 : i32
    return %c0_i32, %arg0 : i32, i32
  }
  func.func @transform_2(%arg0: i32) -> (i32, i32) {
    %c0_i32 = arith.constant 0 : i32
    %c0_i32_0 = arith.constant 0 : i32
    %c0_i32_1 = arith.constant 0 : i32
    return %c0_i32, %c0_i32_0 : i32, i32
  }
  func.func @transform_3(%arg0: i32) -> (i32, i32) {
    %c0_i32 = arith.constant 0 : i32
    %c0_i32_0 = arith.constant 0 : i32
    %c0_i32_1 = arith.constant 0 : i32
    return %c0_i32, %c0_i32_0 : i32, i32
  }
  func.func @transform_4(%arg0: i32) -> (i32, i32) {
    %c0_i32 = arith.constant 0 : i32
    %c0_i32_0 = arith.constant 0 : i32
    %c0_i32_1 = arith.constant 0 : i32
    return %c0_i32, %c0_i32_0 : i32, i32
  }
  func.func @transform_5(%arg0: i32) -> (i32, i32) {
    %c0_i32 = arith.constant 0 : i32
    %c0_i32_0 = arith.constant 0 : i32
    %c0_i32_1 = arith.constant 0 : i32
    return %c0_i32, %c0_i32_0 : i32, i32
  }
  func.func @transform_6(%arg0: i32) -> (i32, i32) {
    %c0_i32 = arith.constant 0 : i32
    %c0_i32_0 = arith.constant 0 : i32
    %c0_i32_1 = arith.constant 0 : i32
    return %c0_i32, %c0_i32_0 : i32, i32
  }
  func.func @transform_7(%arg0: i32) -> (i32, i32) {
    %c0_i32 = arith.constant 0 : i32
    %c0_i32_0 = arith.constant 0 : i32
    %c0_i32_1 = arith.constant 0 : i32
    return %c0_i32, %c0_i32_0 : i32, i32
  }
  func.func @transform_8(%arg0: i32) -> (i32, i32) {
    %c0_i32 = arith.constant 0 : i32
    %c0_i32_0 = arith.constant 0 : i32
    %c0_i32_1 = arith.constant 0 : i32
    return %c0_i32, %c0_i32_0 : i32, i32
  }
  func.func @transform_9(%arg0: i32) -> (i32, i32) {
    %c0_i32 = arith.constant 0 : i32
    %c0_i32_0 = arith.constant 0 : i32
    %c0_i32_1 = arith.constant 0 : i32
    return %c0_i32, %c0_i32_0 : i32, i32
  }
  func.func @transform_10(%arg0: i32) -> (i32, i32) {
    %c0_i32 = arith.constant 0 : i32
    %c0_i32_0 = arith.constant 0 : i32
    %c0_i32_1 = arith.constant 0 : i32
    return %c0_i32, %c0_i32_0 : i32, i32
  }
  func.func @transform_11(%arg0: i32) -> (i32, i32) {
    %c0_i32 = arith.constant 0 : i32
    %c0_i32_0 = arith.constant 0 : i32
    return %c0_i32, %arg0 : i32, i32
  }
}

</mosaic_0001>

<bundles_post_ra>
// kernel: tpu_custom_call.1
= control target key start
LH: loop header
LB: loop body
LE: loop exit
PB: predicated region body
PF: predicated region fallthrough
CT: control target
= control target key end

     0   :  { %s2247_s0 = inlined_call_operand.vmem [shape: f32[2,512], index: 0, kind: input, shape index: {}]   ;;  %s2248_s1 = inlined_call_operand.vmem [shape: f32[24,512], index: 1, kind: input, shape index: {}]   ;;  %s2249_s2 = inlined_call_operand.vmem [shape: f32[8,2], index: 2, kind: input, shape index: {}]   ;;  %s2250_s3 = inlined_call_operand.vmem [shape: f32[3,24], index: 3, kind: input, shape index: {}]   ;;  %s2251_s4 = inlined_call_operand.vmem [shape: f32[32,8], index: 4, kind: input, shape index: {}]   ;;  %s2252_s5 = inlined_call_operand.vmem [shape: f32[32,8], index: 5, kind: input, shape index: {}]   ;;  %s2253_s6 = inlined_call_operand.vmem [shape: f32[32,1], index: 6, kind: input, shape index: {}]   ;;  %s2254_s7 = inlined_call_operand.vmem [shape: f32[32,32], index: 7, kind: input, shape index: {}]   ;;  %s2255_s8 = inlined_call_operand.vmem [shape: f32[32,1], index: 8, kind: input, shape index: {}]   ;;  %s2256_s9 = inlined_call_operand.vmem [shape: f32[24,32], index: 9, kind: input, shape index: {}]   ;;  %s2257_s10 = inlined_call_operand.vmem [shape: f32[24,1], index: 10, kind: input, shape index: {}]   ;;  %s2258_s11 = inlined_call_operand.hbm [shape: f32[3,512], index: 11, kind: output, shape index: {}]  }
   0x1   :  { %2260 = sst [smem:[#allocation6_spill]] %s2247_s0 }
   0x2   :  { %2261 = sst [smem:[#allocation7_spill]] %s2248_s1 }
   0x3   :  { %16 = vsyncpa [#allocation4], 0 }
   0x4   :  { %18 = vsyncpa [#allocation4 + $0x1], 0  ;;  %s1949_s17 = smov 0   ;;  %s1951_s18 = smov 0  }
   0x5   :  { %s1953_s19 = smov 0   ;;  %s1955_s20 = smov 0  }
   0x6 LB: > { %s1970_s21 = sadd.s32 4294967295, %s1878_s20   ;;  %s1675_s22 = sadd.s32 4294967294, %s1878_s20   ;;  %s1878_s20 = sphi %s1955_s20, %s2272_s20   ;;  %s1874_s19 = sphi %s1953_s19, %s2271_s19   ;;  %s1870_s18 = sphi %s1951_s18, %s2270_s18   ;;  %s1866_s17 = sphi %s1949_s17, %s2269_s17  }
   0x7   : > { %s1974_s23 = sadd.s32 1, %s1878_s20   ;;  %s57_s24 = sadd.s32 1, %s1874_s19 }
   0x8   : > { %s54_s25 = ssub.s32 %s1878_s20, %s1974_s23  ;;  %p64_p0 = scmp.ne.s32.totalorder %s1874_s19, %s1870_s18 }
   0x9   : > { %p55_p1 = scmp.eq.s32.totalorder %s54_s25, 0  ;;  %p65_p2 = scmp.eq.s32.totalorder %s1878_s20, 0 }
   0xa   : > { %p283_p3 = scmp.eq.s32.totalorder %s1970_s21, 1  ;;  %p288_p4 = scmp.ne.s32.totalorder %s1870_s18, %s1866_s17 }
   0xb   : > { %s1986_s26 = scalar_select %p55_p1, %s1874_s19, %s57_s24  }
   0xc   : > { %p66_p5 = por %p65_p2, %p64_p0  ;;  %p1988_p6 = por %p283_p3, %p64_p0 }
   0xd   : > { %p289_p7 = scmp.eq.s32.totalorder %s1675_s22, 1  ;;  %p2259_p9 = scmp.ge.s32.totalorder %s1878_s20, 2 }
   0xf   : > { %p1992_p8 = por %p289_p7, %p288_p4  ;;  %332 = sbr.rel (%p2259_p9) target bundleno = 33 (0x21), region = 52 }
  0x14   : > { %344 = sbr.rel (!%p66_p5) target bundleno = 33 (0x21), region = 60  ;;  %s346_s29 = sand.u32 (%p66_p5), 1, %s1874_s19  }
  0x15   : > { %s1725_s30 = sshll.u32 (%p66_p5), %s1878_s20, 4  ;;  %s1727_s12 = smul.u32 (%p66_p5), 48, %s346_s29 }
  0x16   : > { %s2264_s1 = sld [smem:[#allocation7_spill]] (%p66_p5) }
  0x17   : > { %s348_s16 = scalar_lea.vmem (%p66_p5), [#allocation2], %s1727_s12 }
  0x1c   : > { %s351_s15 = scalar_lea.vmem %s2264_s1, %s1725_s30 }
  0x1d   : > { %v364_v0 = vld [vmem:[%s351_s15] sm:$0xff]  ;;  %v366_v1 = vld [vmem:[%s351_s15 + $0x8] sm:$0xff] }
  0x1e   : > { %v368_v2 = vld [vmem:[%s351_s15 + $0x20] sm:$0xff]  ;;  %v370_v3 = vld [vmem:[%s351_s15 + $0x28] sm:$0xff]  ;;  %365 = vst [vmem:[%s348_s16] sm:$0xff] %v364_v0  ;;  %367 = vst [vmem:[%s348_s16 + $0x8] sm:$0xff] %v366_v1 }
  0x1f   : > { %v372_v4 = vld [vmem:[%s351_s15 + $0x40] sm:$0xff]  ;;  %v374_v5 = vld [vmem:[%s351_s15 + $0x48] sm:$0xff]  ;;  %369 = vst [vmem:[%s348_s16 + $0x10] sm:$0xff] %v368_v2  ;;  %371 = vst [vmem:[%s348_s16 + $0x18] sm:$0xff] %v370_v3 }
  0x20   : > { %373 = vst [vmem:[%s348_s16 + $0x20] sm:$0xff] %v372_v4  ;;  %375 = vst [vmem:[%s348_s16 + $0x28] sm:$0xff] %v374_v5 }
  0x21 PF: > { %p1680_p10 = scmp.ge.s32.totalorder %s1878_s20, 1  ;;  %p380_p11 = scmp.lt.s32.totalorder %s1878_s20, 3 }
  0x23   : > { %p381_p12 = pnand %p1680_p10, %p380_p11 }
  0x24   : > { %s1682_s22 = sshll.u32 (!%p381_p12), %s1970_s21, 1  ;;  %s2265_s0 = sld [smem:[#allocation6_spill]] (!%p381_p12) }
  0x25   : > { %384 = sbr.rel (%p381_p12) target bundleno = 1216 (0x4c0), region = 83  ;;  %p432_p13 = scmp.lt.s32.totalorder (!%p381_p12), %s1682_s22, 3 }
  0x26   : > { %s2205_s16 = sand.u32 (!%p381_p12), 1, %s1870_s18   ;;  %s1726_s12 = sshll.u32 (!%p381_p12), %s1970_s21, 7 }
  0x27   : > { %s1584_s25 = scalar_lea.sflag (!%p381_p12), [#allocation4], %s2205_s16 }
  0x2a   : > { %v1880_v6 = vmov 0.0   ;;  %s2274_s22 = smov (!%p432_p13, %s1682_s22), 3  ;;  %vm454_vm0 = vcmask 1041408   ;;  %v439_v9 = vld [vmem:[%s2249_s2] sm:$0xff]  ;;  %vm450_vm1 = vcmask 15360   ;;  %v1158_v10 = vld [vmem:[%s2253_s6 + $0x18] sm:$0xff] }
  0x2b   : > { %523 = vmatprep.mubr.f32.mxu0 %v1880_v6  ;;  %1029 = vmatprep.mubr.f32.mxu1 %v1880_v6  ;;  %s1683_s24 = sshll.u32 %s2274_s22, 1  ;;  %v1881_v11 = vmov 0   ;;  %v1156_v12 = vld [vmem:[%s2253_s6 + $0x8] sm:$0xff]  ;;  %v1157_v13 = vld [vmem:[%s2253_s6 + $0x10] sm:$0xff]  ;;  %v1155_v14 = vld [vmem:[%s2253_s6] sm:$0xff]  ;;  %s1728_s22 = smul.u32 48, %s2205_s16 }
  0x2c   : > { %s435_s30 = scalar_lea.vmem %s2265_s0, %s1683_s24  ;;  %1784 = vset.pattern.permute.xlu0 %v1881_v11  ;;  %1785 = vset.pattern.permute.xlu1 %v1881_v11  ;;  %v1218_v15 = vld [vmem:[%s2255_s8 + $0x18] sm:$0xff]  ;;  %v1217_v16 = vld [vmem:[%s2255_s8 + $0x10] sm:$0xff]  ;;  %v1216_v17 = vld [vmem:[%s2255_s8 + $0x8] sm:$0xff]  ;;  %v1882_v42 = vmov 683565275   ;;  %s1888_s0 = smov [#allocation3]  }
  0x2d   : > { %v1684_v7 = vld.sshfl [vmem:[%s435_s30] sm:$0x33 pattern:$0x76325410]  ;;  %1176 = vperm.xlu0 %1784, %v1158_v10   ;;  %1166 = vperm.xlu1 %1785, %v1156_v12   ;;  %v1370_v19 = vld [vmem:[%s2257_s10 + $0x10] sm:$0xff]  ;;  %v1369_v20 = vld [vmem:[%s2257_s10 + $0x8] sm:$0xff] }
  0x2e   : > { %v449_v8 = vcombine.high %v1684_v7, %v1684_v7  ;;  %v1215_v18 = vld [vmem:[%s2255_s8] sm:$0xff]  ;;  %v1883_v45 = vmov 2475754826   ;;  %v1884_v47 = vmov 2131351028   ;;  %s389_s24 = scalar_lea.vmem [#allocation2], %s1728_s22 }
  0x2f   : > { %v1368_v24 = vld [vmem:[%s2257_s10] sm:$0xff]  ;;  %v1885_v49 = vmov 2102212464   ;;  %v1886_v51 = vmov 920167782   ;;  %s1681_s30 = sshll.u32 %s2205_s16, 3 }
  0x30   : > { %1685 = vmatprep.subr.msk.mxu0 %vm454_vm0, %v449_v8  ;;  %v1887_v58 = vmov 1326507024   ;;  %s430_s13 = scalar_lea.vmem [#allocation3], %s1681_s30  ;;  %s1822_s1 = sshll.u32 %s1888_s0, 4  ;;  %s1823_s1 = int_to_ptr.vmem [resolvable:$false] %s1822_s1 }
  0x31   : > { %1686 = vmatpush1.msk.msra.mxu0 %vm454_vm0, %v1684_v7  ;;  %1171 = vperm.xlu0 %1784, %v1157_v13   ;;  %s1598_s14 = sshll.u32 %s430_s13, 4  ;;  %s1824_s21 = scalar_lea.vmem %s1823_s1, 256  ;;  %s1599_s14 = int_to_ptr.vmem [resolvable:$true] %s1598_s14 }
  0x32   : > { %1687 = vmatmul.mubr.msk.f32.vlgmr.msra.gmra.mxu0 %vm450_vm1, %v439_v9  ;;  %1161 = vperm.xlu1 %1785, %v1155_v14   ;;  %s1818_s29 = scalar_lea.vmem %s1599_s14, 128  ;;  %p1825_p3 = scmp.lt.s32.totalorder %s1599_s14, %s1823_s1 }
  0x33   : > { %1130 = vmatprep.mubr.f32.mxu0 %v1880_v6  ;;  %p1819_p0 = scmp.ne.s32.totalorder %s1599_s14, %s1818_s29  ;;  %p1826_p4 = scmp.lt.s32.totalorder %s1824_s21, %s1818_s29 }
  0x35   : > { %1236 = vperm.xlu0 %1784, %v1218_v15   ;;  %p1820_p1 = pnand %p1819_p0, %p1988_p6  ;;  %p1827_p5 = por %p1826_p4, %p1825_p3 }
  0x36   : > { %1231 = vperm.xlu1 %1785, %v1217_v16  }
  0x37   : > { %p1821_p2 = pneg %p1820_p1 }
  0x39   : > { %1226 = vperm.xlu0 %1784, %v1216_v17   ;;  %p1828_p7 = pnand %p1827_p5, %p1821_p2 }
  0x3a   : > { %1221 = vperm.xlu1 %1785, %v1215_v18  }
  0x3d   : > { %1383 = vperm.xlu0 %1784, %v1370_v19  }
  0x3e   : > { %1378 = vperm.xlu1 %1785, %v1369_v20  }
  0x41   : > { %1373 = vperm.xlu0 %1784, %v1368_v24  }
  0xf2   : > { %v2046_v21 = vpop.f32.mrf.mxu0 }
  0xf3   : > { %v534_v22 = vand.u32 2147483647, %v2046_v21  ;;  %v537_v23 = vand.u32 2139095040, %v2046_v21  ;;  %vm536_vm0 = vcmp.lt.s32.totalorder %v2046_v21, 0 }
  0xf4   : > { %v2053_v25 = vpop.f32.mrf.mxu0 }
  0xf5   : > { %v538_v26 = vshrl.u32 %v537_v23, 23  ;;  %v541_v27 = vand.u32 8388607, %v534_v22  ;;  %v641_v28 = vand.u32 2139095040, %v2053_v25  ;;  %v638_v30 = vand.u32 2147483647, %v2053_v25 }
  0xf6   : > { %vm2108_vm1 = vcmp.le.f32.partialorder %v534_v22, 0.7853982 }
  0xf7   : > { %v1688_v29 = vadd.s32 4294967169, %v538_v26  ;;  %v642_v31 = vshrl.u32 %v641_v28, 23  ;;  %v542_v33 = vor.u32 8388608, %v541_v27  ;;  %v645_v35 = vand.u32 8388607, %v638_v30 }
  0xf9   : > { %v544_v32 = vadd.s32 1, %v1688_v29  ;;  %v1692_v34 = vadd.s32 4294967169, %v642_v31  ;;  %v2061_v40 = vshll.u32 %v542_v33, 8  ;;  %v646_v44 = vor.u32 8388608, %v645_v35 }
  0xfb   : > { %vm545_vm2 = vcmp.gt.s32.totalorder %v544_v32, 0  ;;  %v648_v37 = vadd.s32 1, %v1692_v34  ;;  %v686_v14 = vshll.u32 %v646_v44, 8 }
  0xfc   : > { %v546_v36 = vsel %vm545_vm2, %v544_v32, 0  ;;  %vm640_vm2 = vcmp.lt.s32.totalorder %v2053_v25, 0 }
  0xfd   : > { %v547_v38 = vshrl.u32 %v546_v36, 5  ;;  %v548_v39 = vand.u32 31, %v546_v36  ;;  %vm649_vm3 = vcmp.gt.s32.totalorder %v648_v37, 0 }
  0xfe   : > { %v650_v63 = vsel %vm649_vm3, %v648_v37, 0  ;;  %vm639_vm3 = vcmp.le.f32.partialorder %v638_v30, 0.7853982 }
  0xff   : > { %v549_v41 = vsub.s32 32, %v548_v39  ;;  %v551_v43 = vshll.u32 %v1882_v42, %v548_v39  ;;  %v554_v46 = vshll.u32 %v1883_v45, %v548_v39  ;;  %v557_v48 = vshll.u32 %v1884_v47, %v548_v39 }
 0x100   : > { %v560_v50 = vshll.u32 %v1885_v49, %v548_v39  ;;  %v563_v52 = vshll.u32 %v1886_v51, %v548_v39  ;;  %vm566_vm4 = vcmp.lt.s32.totalorder %v547_v38, 1  ;;  %vm568_vm5 = vcmp.lt.s32.totalorder %v547_v38, 3 }
 0x101   : > { %v552_v53 = vshrl.u32 %v1883_v45, %v549_v41  ;;  %v555_v54 = vshrl.u32 %v1884_v47, %v549_v41  ;;  %v558_v55 = vshrl.u32 %v1885_v49, %v549_v41  ;;  %v550_v56 = vshrl.u32 %v1882_v42, %v549_v41 }
 0x102   : > { %v561_v57 = vshrl.u32 %v1886_v51, %v549_v41  ;;  %v564_v59 = vshrl.u32 %v1887_v58, %v549_v41  ;;  %vm569_vm6 = vcmp.lt.s32.totalorder %v547_v38, 4  ;;  %v652_v2 = vand.u32 31, %v650_v63 }
 0x103   : > { %v553_v60 = vor.u32 %v552_v53, %v551_v43  ;;  %v556_v61 = vor.u32 %v555_v54, %v554_v46  ;;  %v559_v62 = vor.u32 %v558_v55, %v557_v48  ;;  %vm567_vm7 = vcmp.lt.s32.totalorder %v547_v38, 2 }
 0x104   : > { %v562_v0 = vor.u32 %v561_v57, %v560_v50  ;;  %v565_v1 = vor.u32 %v564_v59, %v563_v52  ;;  %v653_v11 = vsub.s32 32, %v652_v2  ;;  %v651_v18 = vshrl.u32 %v650_v63, 5 }
 0x105   : > { %v570_v3 = vsel %vm566_vm4, %v550_v56, %v553_v60  ;;  %v571_v4 = vsel %vm569_vm6, %v559_v62, 2102212464  ;;  %v574_v5 = vsel %vm566_vm4, %v553_v60, %v556_v61  ;;  %v578_v7 = vsel %vm566_vm4, %v556_v61, %v559_v62 }
 0x106   : > { %v572_v8 = vsel %vm568_vm5, %v556_v61, %v571_v4  ;;  %v575_v9 = vsel %vm569_vm6, %v562_v0, 920167782  ;;  %v579_v10 = vsel %vm569_vm6, %v565_v1, 1326507024  ;;  %v655_v26 = vshll.u32 %v1882_v42, %v652_v2 }
 0x107   : > { %v576_v12 = vsel %vm568_vm5, %v559_v62, %v575_v9  ;;  %v580_v13 = vsel %vm568_vm5, %v562_v0, %v579_v10  ;;  %v573_v15 = vsel %vm567_vm7, %v570_v3, %v572_v8  ;;  %v656_v27 = vshrl.u32 %v1883_v45, %v653_v11 }
 0x108   : > { %v577_v16 = vsel %vm567_vm7, %v574_v5, %v576_v12  ;;  %v581_v17 = vsel %vm567_vm7, %v578_v7, %v580_v13  ;;  %v658_v28 = vshll.u32 %v1883_v45, %v652_v2  ;;  %v659_v29 = vshrl.u32 %v1884_v47, %v653_v11 }
 0x109   : > { %v2073_v19 = vmul.u32.u64.low %v2061_v40, %v581_v17  ;;  %v2074_v20 = vmul.u32.u64.high %v2061_v40, %v581_v17, %v2073_v19  ;;  %v2077_v23 = vmul.u32.u64.low %v2061_v40, %v577_v16  ;;  %v2078_v24 = vmul.u32.u64.high %v2061_v40, %v577_v16, %v2077_v23 }
 0x10a   : > { %v661_v31 = vshll.u32 %v1884_v47, %v652_v2  ;;  %v662_v32 = vshrl.u32 %v1885_v49, %v653_v11  ;;  %v664_v33 = vshll.u32 %v1885_v49, %v652_v2  ;;  %v665_v34 = vshrl.u32 %v1886_v51, %v653_v11 }
 0x10b   : > { %v657_v35 = vor.u32 %v656_v27, %v655_v26  ;;  %v660_v36 = vor.u32 %v659_v29, %v658_v28  ;;  %v667_v37 = vshll.u32 %v1886_v51, %v652_v2  ;;  %v668_v38 = vshrl.u32 %v1887_v58, %v653_v11 }
 0x10c   : > { %v589_v39 = vmul.u32 %v2061_v40, %v573_v15  ;;  %vm591_vm8 = vc.u32 %v2074_v20, %v2077_v23  ;;  %v592_v41 = vadd.s32 1, %v2078_v24  ;;  %v663_v43 = vor.u32 %v662_v32, %v661_v31 }
 0x10d   : > { %v654_v44 = vshrl.u32 %v1882_v42, %v653_v11  ;;  %v666_v45 = vor.u32 %v665_v34, %v664_v33  ;;  %v669_v46 = vor.u32 %v668_v38, %v667_v37  ;;  %vm670_vm9 = vcmp.lt.s32.totalorder %v651_v18, 1 }
 0x10e   : > { %v593_v47 = vsel %vm591_vm8, %v592_v41, %v2078_v24  ;;  %vm672_vm10 = vcmp.lt.s32.totalorder %v651_v18, 3  ;;  %vm673_vm11 = vcmp.lt.s32.totalorder %v651_v18, 4  ;;  %v678_v48 = vsel %vm670_vm9, %v657_v35, %v660_v36 }
 0x10f   : > { %v594_v49 = vadd.s32 %v593_v47, %v589_v39  ;;  %v675_v50 = vsel %vm673_vm11, %v663_v43, 2102212464  ;;  %v679_v51 = vsel %vm673_vm11, %v666_v45, 920167782  ;;  %v682_v40 = vsel %vm670_vm9, %v660_v36, %v663_v43 }
 0x110   : > { %vm671_vm12 = vcmp.lt.s32.totalorder %v651_v18, 2  ;;  %v674_v52 = vsel %vm670_vm9, %v654_v44, %v657_v35  ;;  %v680_v53 = vsel %vm672_vm10, %v663_v43, %v679_v51  ;;  %v683_v54 = vsel %vm673_vm11, %v669_v46, 1326507024 }
 0x111   : > { %v595_v55 = vadd.s32 536870912, %v594_v49  ;;  %v676_v56 = vsel %vm672_vm10, %v660_v36, %v675_v50  ;;  %v681_v57 = vsel %vm671_vm12, %v678_v48, %v680_v53  ;;  %v684_v42 = vsel %vm672_vm10, %v666_v45, %v683_v54 }
 0x112   : > { %v685_v58 = vsel %vm671_vm12, %v682_v40, %v684_v42  ;;  %v2088_v59 = vmul.u32.u64.low %v686_v14, %v681_v57  ;;  %v2089_v60 = vmul.u32.u64.high %v686_v14, %v681_v57, %v2088_v59  ;;  %v677_v0 = vsel %vm671_vm12, %v674_v52, %v676_v56 }
 0x113   : > { %v2091_v61 = vshrl.u32 %v595_v55, 30  ;;  %v2093_v62 = vmul.u32.u64.low %v686_v14, %v685_v58  ;;  %v2094_v63 = vmul.u32.u64.high %v686_v14, %v685_v58, %v2093_v62  ;;  %v693_v4 = vmul.u32 %v686_v14, %v677_v0 }
 0x114   : > { %v696_v2 = vadd.s32 1, %v2089_v60  ;;  %v590_v18 = vadd.s32 %v2077_v23, %v2074_v20 }
 0x115   : > { %v597_v1 = vshll.u32 %v2091_v61, 30  ;;  %vm695_vm13 = vc.u32 %v2094_v63, %v2088_v59  ;;  %v694_v41 = vadd.s32 %v2088_v59, %v2094_v63  ;;  %v620_v55 = vsub.s32 4, %v2091_v61 }
 0x116   : > { %v697_v5 = vsel %vm695_vm13, %v696_v2, %v2089_v60 }
 0x117   : > { %v598_v3 = vsub.s32 %v594_v49, %v597_v1  ;;  %v698_v8 = vadd.s32 %v697_v5, %v693_v4  ;;  %v621_v42 = vsel %vm536_vm0, %v620_v55, %v2091_v61 }
 0x118   : > { %v623_v60 = vsel %vm2108_vm1, 0, %v621_v42 }
 0x119   : > { %v600_v7 = vsub.s32 0, %v598_v3  ;;  %v699_v10 = vadd.s32 536870912, %v698_v8  ;;  %v627_v63 = vadd.s32 3, %v623_v60  ;;  %v839_v30 = vand.u32 3, %v623_v60 }
 0x11b   : > { %v1689_v9 = vmin.u32 %v600_v7, %v598_v3  ;;  %v700_v12 = vshrl.u32 %v699_v10, 30  ;;  %vm840_vm5 = vcmp.lt.s32.totalorder %v839_v30, 2  ;;  %vm841_vm6 = vcmp.eq.s32.totalorder %v839_v30, 0 }
 0x11c   : > { %vm844_vm7 = vcmp.eq.s32.totalorder %v839_v30, 2 }
 0x11d   : > { %v602_v11 = vclz %v1689_v9  ;;  %v701_v15 = vshll.u32 %v700_v12, 30  ;;  %v724_v57 = vsub.s32 4, %v700_v12 }
 0x11f   : > { %v1690_v13 = vadd.s32 4294967294, %v602_v11  ;;  %v702_v16 = vsub.s32 %v698_v8, %v701_v15  ;;  %v725_v59 = vsel %vm640_vm2, %v724_v57, %v700_v12 }
 0x120   : > { %v727_v62 = vsel %vm639_vm3, 0, %v725_v59 }
 0x121   : > { %vm1691_vm14 = vcmp.lt.s32.totalorder %v1690_v13, 0  ;;  %v704_v24 = vsub.s32 0, %v702_v16  ;;  %v731_v2 = vadd.s32 3, %v727_v62  ;;  %v942_v4 = vand.u32 3, %v727_v62 }
 0x122   : > { %v605_v17 = vsel %vm1691_vm14, 0, %v1690_v13 }
 0x123   : > { %v606_v19 = vsub.s32 32, %v605_v17  ;;  %v610_v14 = vsub.s32 4294967266, %v605_v17  ;;  %v607_v26 = vshll.u32 %v598_v3, %v605_v17  ;;  %v1693_v29 = vmin.u32 %v704_v24, %v702_v16 }
 0x124   : > { %v628_v3 = vand.u32 3, %v627_v63  ;;  %v732_v8 = vand.u32 3, %v731_v2  ;;  %vm943_vm8 = vcmp.lt.s32.totalorder %v942_v4, 2  ;;  %vm944_vm11 = vcmp.eq.s32.totalorder %v942_v4, 0 }
 0x125   : > { %v608_v27 = vshrl.u32 %v590_v18, %v606_v19  ;;  %v611_v28 = vadd.s32 127, %v610_v14  ;;  %v706_v33 = vclz %v1693_v29  ;;  %vm947_vm12 = vcmp.eq.s32.totalorder %v942_v4, 2 }
 0x126   : > { %vm633_vm4 = vcmp.eq.s32.totalorder %v628_v3, 2  ;;  %vm629_vm9 = vcmp.lt.s32.totalorder %v628_v3, 2  ;;  %vm630_vm10 = vcmp.eq.s32.totalorder %v628_v3, 0  ;;  %vm737_vm13 = vcmp.eq.s32.totalorder %v732_v8, 2 }
 0x127   : > { %v609_v31 = vor.u32 %v608_v27, %v607_v26  ;;  %v612_v32 = vshll.u32 %v611_v28, 23  ;;  %v1694_v35 = vadd.s32 4294967294, %v706_v33  ;;  %vm733_vm14 = vcmp.lt.s32.totalorder %v732_v8, 2  ;;  %v530_v33 = vld [vmem:[%s2251_s4] sm:$0xff] }
 0x129   : > { %v613_v34 = vor.u32 4788187, %v612_v32  ;;  %v616_v37 = vcvt.s32.f32 %v609_v31  ;;  %vm1695_vm15 = vcmp.lt.s32.totalorder %v1694_v35, 0  ;;  %v742_v32 = vld [vmem:[%s2252_s5] sm:$0xff] }
 0x12a   : > { %v709_v38 = vsel %vm1695_vm15, 0, %v1694_v35  ;;  %vm734_vm15 = vcmp.eq.s32.totalorder %v732_v8, 0  ;;  %v531_v35 = vld [vmem:[%s2251_s4 + $0x8] sm:$0xff] }
 0x12b   : > { %v614_v36 = vand.u32 2147483647, %v613_v34  ;;  %v710_v20 = vsub.s32 32, %v709_v38  ;;  %v714_v23 = vsub.s32 4294967266, %v709_v38  ;;  %v711_v44 = vshll.u32 %v702_v16, %v709_v38  ;;  %v745_v38 = vld [vmem:[%s2252_s5 + $0x18] sm:$0xff] }
 0x12d   : > { %v617_v39 = vmul.f32 %v616_v37, %v614_v36  ;;  %v712_v45 = vshrl.u32 %v694_v41, %v710_v20  ;;  %v715_v46 = vadd.s32 127, %v714_v23  ;;  %v744_v36 = vld [vmem:[%s2252_s5 + $0x10] sm:$0xff] }
 0x12e   : > { %v532_v37 = vld [vmem:[%s2251_s4 + $0x10] sm:$0xff] }
 0x12f   : > { %v618_v43 = vxor.u32 2147483648, %v617_v39  ;;  %v713_v48 = vor.u32 %v712_v45, %v711_v44  ;;  %v716_v49 = vshll.u32 %v715_v46, 23 }
 0x131   : > { %v619_v47 = vsel %vm536_vm0, %v618_v43, %v617_v39  ;;  %v717_v40 = vor.u32 4788187, %v716_v49  ;;  %v720_v53 = vcvt.s32.f32 %v713_v48  ;;  %vm730_vm0 = vweird.f32 %v2053_v25  ;;  %v533_v39 = vld [vmem:[%s2251_s4 + $0x18] sm:$0xff]  ;;  %v1177_v48 = vpop.permute.xlu0 %1176 }
 0x132   : > { %v622_v51 = vsel %vm2108_vm1, %v2046_v21, %v619_v47  ;;  %vm626_vm1 = vweird.f32 %v2046_v21  ;;  %v743_v21 = vld [vmem:[%s2252_s5 + $0x8] sm:$0xff] }
 0x133   : > { %v718_v52 = vand.u32 2147483647, %v717_v40  ;;  %1786 = vcosq.f32 %v622_v51 }
 0x134   : > { %1788 = vsinq.f32 %v622_v51 }
 0x135   : > { %v721_v54 = vmul.f32 %v720_v53, %v718_v52  ;;  %v1167_v52 = vpop.permute.xlu1 %1166  ;;  %v1172_v57 = vpop.permute.xlu0 %1171 }
 0x137   : > { %v722_v56 = vxor.u32 2147483648, %v721_v54 }
 0x139   : > { %v723_v22 = vsel %vm640_vm2, %v722_v56, %v721_v54  ;;  %vm952_vm2 = vcmask 64512   ;;  %v1162_v30 = vpop.permute.xlu1 %1161 }
 0x13a   : > { %v726_v58 = vsel %vm639_vm3, %v2053_v25, %v723_v22 }
 0x13b   : > { %1790 = vcosq.f32 %v726_v58 }
 0x13c   : > { %1792 = vsinq.f32 %v726_v58 }
 0x140   : > { %v1787_v0 = vpop.eup %1786 }
 0x141   : > { %v1789_v1 = vpop.eup %1788  ;;  %v634_v5 = vxor.u32 2147483648, %v1787_v0 }
 0x142   : > { %v631_v7 = vxor.u32 2147483648, %v1789_v1 }
 0x143   : > { %v635_v9 = vsel %vm633_vm4, %v634_v5, %v1789_v1  ;;  %v846_v15 = vsel %vm844_vm7, %v634_v5, %v1789_v1 }
 0x144   : > { %v632_v12 = vsel %vm630_vm10, %v1787_v0, %v631_v7  ;;  %v843_v13 = vsel %vm841_vm6, %v1787_v0, %v631_v7 }
 0x145   : > { %v636_v24 = vsel %vm629_vm9, %v632_v12, %v635_v9  ;;  %v847_v26 = vsel %vm840_vm5, %v843_v13, %v846_v15 }
 0x146   : > { %v637_v34 = vsel %vm626_vm1, nan, %v636_v24  ;;  %v848_v25 = vsel %vm626_vm1, nan, %v847_v26 }
 0x148   : > { %v1791_v61 = vpop.eup %1790 }
 0x149   : > { %v1793_v10 = vpop.eup %1792  ;;  %v738_v11 = vxor.u32 2147483648, %v1791_v61 }
 0x14a   : > { %v735_v16 = vxor.u32 2147483648, %v1793_v10 }
 0x14b   : > { %v949_v17 = vsel %vm947_vm12, %v738_v11, %v1793_v10  ;;  %v739_v18 = vsel %vm737_vm13, %v738_v11, %v1793_v10 }
 0x14c   : > { %v946_v19 = vsel %vm944_vm11, %v1791_v61, %v735_v16  ;;  %v736_v14 = vsel %vm734_vm15, %v1791_v61, %v735_v16  ;;  %vm1239_vm11 = vcmask 261120  }
 0x14d   : > { %v950_v27 = vsel %vm943_vm8, %v946_v19, %v949_v17  ;;  %v740_v28 = vsel %vm733_vm14, %v736_v14, %v739_v18 }
 0x14e   : > { %v951_v29 = vsel %vm730_vm0, nan, %v950_v27  ;;  %v741_v31 = vsel %vm730_vm0, nan, %v740_v28 }
 0x14f   : > { %995 = vmatprep.subr.mxu1 %v951_v29  ;;  %1096 = vmatprep.subr.mxu0 %v741_v31  ;;  %v1211_v29 = vld [vmem:[%s2254_s7] sm:$0xff] }
 0x150   : > { %996 = vmatpush1.msra.mxu1 %v848_v25  ;;  %1097 = vmatpush1.msra.mxu0 %v637_v34  ;;  %v1214_v34 = vld [vmem:[%s2254_s7 + $0x18] sm:$0xff] }
 0x151   : > { %1704 = vmatmul.mubr.msk.f32.vlgmr.msra.gmra.mxu1 %vm952_vm2, %v742_v32  ;;  %1708 = vmatmul.mubr.msk.f32.vlgmr.msra.gmra.mxu0 %vm952_vm2, %v530_v33  ;;  %v1212_v32 = vld [vmem:[%s2254_s7 + $0x8] sm:$0xff]  ;;  %v1213_v33 = vld [vmem:[%s2254_s7 + $0x10] sm:$0xff] }
 0x152   : > { %1035 = vmatprep.mubr.f32.mxu1 %v1880_v6  ;;  %1136 = vmatprep.mubr.f32.mxu0 %v1880_v6 }
 0x155   : > { %1705 = vmatmul.mubr.msk.f32.gmra.mxu1 %vm952_vm2, %v743_v21  ;;  %1709 = vmatmul.mubr.msk.f32.gmra.mxu0 %vm952_vm2, %v531_v35 }
 0x156   : > { %1041 = vmatprep.mubr.f32.mxu1 %v1880_v6  ;;  %1142 = vmatprep.mubr.f32.mxu0 %v1880_v6 }
 0x159   : > { %1706 = vmatmul.mubr.msk.f32.gmra.mxu1 %vm952_vm2, %v744_v36  ;;  %1710 = vmatmul.mubr.msk.f32.gmra.mxu0 %vm952_vm2, %v532_v37  ;;  %v1237_v37 = vpop.permute.xlu0 %1236 }
 0x15a   : > { %1047 = vmatprep.mubr.f32.mxu1 %v1880_v6  ;;  %1148 = vmatprep.mubr.f32.mxu0 %v1880_v6 }
 0x15d   : > { %1707 = vmatmul.mubr.msk.f32.gmra.mxu1 %vm952_vm2, %v745_v38  ;;  %1711 = vmatmul.mubr.msk.f32.gmra.mxu0 %vm952_vm2, %v533_v39  ;;  %v1232_v39 = vpop.permute.xlu1 %1231 }
 0x15e   : > { %1316 = vmatprep.mubr.f32.mxu1 %v1880_v6  ;;  %1459 = vmatprep.mubr.f32.mxu0 %v1880_v6 }
 0x211   : > { %v1031_v41 = vpop.f32.mrf.mxu1  ;;  %v1132_v20 = vpop.f32.mrf.mxu0 }
 0x212   : > { %v1133_v2 = vadd.f32 %v1132_v20, %v1031_v41 }
 0x213   : > { %v1033_v23 = vpop.f32.mrf.mxu1  ;;  %v1134_v43 = vpop.f32.mrf.mxu0 }
 0x214   : > { %v1135_v58 = vadd.f32 %v1134_v43, %v1033_v23  ;;  %v1179_v11 = vadd.f32 %v1162_v30, %v1133_v2  ;;  %v1365_v2 = vld [vmem:[%s2256_s9] sm:$0xff] }
 0x215   : > { %v1037_v44 = vpop.f32.mrf.mxu1  ;;  %v1138_v45 = vpop.f32.mrf.mxu0 }
 0x216   : > { %v1139_v59 = vadd.f32 %v1138_v45, %v1037_v44  ;;  %v1180_v7 = vadd.f32 %v1162_v30, %v1135_v58  ;;  %v1195_v14 = vmul.f32 0.01, %v1179_v11  ;;  %vm1187_vm10 = vcmp.ge.f32.partialorder %v1179_v11, 0.0  ;;  %v1227_v44 = vpop.permute.xlu0 %1226  ;;  %v1366_v30 = vld [vmem:[%s2256_s9 + $0x8] sm:$0xff] }
 0x217   : > { %v1039_v46 = vpop.f32.mrf.mxu1  ;;  %v1140_v47 = vpop.f32.mrf.mxu0 }
 0x218   : > { %v1141_v22 = vadd.f32 %v1140_v47, %v1039_v46  ;;  %v1181_v8 = vadd.f32 %v1167_v52, %v1139_v59  ;;  %v1196_v19 = vmul.f32 0.01, %v1180_v7  ;;  %vm1188_vm9 = vcmp.ge.f32.partialorder %v1180_v7, 0.0  ;;  %v1222_v47 = vpop.permute.xlu1 %1221 }
 0x219   : > { %v1043_v49 = vpop.f32.mrf.mxu1  ;;  %v1144_v50 = vpop.f32.mrf.mxu0  ;;  %v1203_v31 = vsel %vm1187_vm10, %v1179_v11, %v1195_v14  ;;  %v1486_v11 = vld [vmem:[%s389_s24 + $0x10] sm:$0xff] }
 0x21a   : > { %v1145_v54 = vadd.f32 %v1144_v50, %v1043_v49  ;;  %v1182_v4 = vadd.f32 %v1167_v52, %v1141_v22  ;;  %v1197_v16 = vmul.f32 0.01, %v1181_v8  ;;  %vm1189_vm8 = vcmp.ge.f32.partialorder %v1181_v8, 0.0 }
 0x21b   : > { %v1045_v51 = vpop.f32.mrf.mxu1  ;;  %v1146_v40 = vpop.f32.mrf.mxu0  ;;  %v1204_v28 = vsel %vm1188_vm9, %v1180_v7, %v1196_v19 }
 0x21c   : > { %v1147_v53 = vadd.f32 %v1146_v40, %v1045_v51  ;;  %v1183_v3 = vadd.f32 %v1172_v57, %v1145_v54  ;;  %v1198_v15 = vmul.f32 0.01, %v1182_v4  ;;  %vm1190_vm7 = vcmp.ge.f32.partialorder %v1182_v4, 0.0 }
 0x21d   : > { %v1049_v55 = vpop.f32.mrf.mxu1  ;;  %v1150_v56 = vpop.f32.mrf.mxu0  ;;  %v1205_v27 = vsel %vm1189_vm8, %v1181_v8, %v1197_v16  ;;  %v1484_v8 = vld [vmem:[%s389_s24] sm:$0xff]  ;;  %v1489_v16 = vld [vmem:[%s389_s24 + $0x28] sm:$0xff] }
 0x21e   : > { %v1151_v42 = vadd.f32 %v1150_v56, %v1049_v55  ;;  %v1184_v63 = vadd.f32 %v1172_v57, %v1147_v53  ;;  %v1199_v12 = vmul.f32 0.01, %v1183_v3  ;;  %vm1191_vm6 = vcmp.ge.f32.partialorder %v1183_v3, 0.0 }
 0x21f   : > { %v1051_v60 = vpop.f32.mrf.mxu1  ;;  %v1152_v62 = vpop.f32.mrf.mxu0  ;;  %v1206_v26 = vsel %vm1190_vm7, %v1182_v4, %v1198_v15  ;;  %v1367_v4 = vld [vmem:[%s2256_s9 + $0x10] sm:$0xff]  ;;  %1794 = vtanh.f32 %v1484_v8 }
 0x220   : > { %v1185_v0 = vadd.f32 %v1177_v48, %v1151_v42  ;;  %v1153_v1 = vadd.f32 %v1152_v62, %v1051_v60  ;;  %v1200_v10 = vmul.f32 0.01, %v1184_v63  ;;  %vm1192_vm5 = vcmp.ge.f32.partialorder %v1184_v63, 0.0 }
 0x221   : > { %v1207_v24 = vsel %vm1191_vm6, %v1183_v3, %v1199_v12  ;;  %v1487_v12 = vld [vmem:[%s389_s24 + $0x18] sm:$0xff] }
 0x222   : > { %v1186_v5 = vadd.f32 %v1177_v48, %v1153_v1  ;;  %v1201_v61 = vmul.f32 0.01, %v1185_v0  ;;  %vm1193_vm4 = vcmp.ge.f32.partialorder %v1185_v0, 0.0  ;;  %v1208_v18 = vsel %vm1192_vm5, %v1184_v63, %v1200_v10 }
 0x224   : > { %vm1194_vm3 = vcmp.ge.f32.partialorder %v1186_v5, 0.0  ;;  %v1202_v9 = vmul.f32 0.01, %v1186_v5  ;;  %v1209_v17 = vsel %vm1193_vm4, %v1185_v0, %v1201_v61  ;;  %v1485_v61 = vld [vmem:[%s389_s24 + $0x8] sm:$0xff]  ;;  %vm1503_vm4 = vcmask 195584  }
 0x225   : > { %1796 = vtanh.f32 %v1485_v61 }
 0x226   : > { %v1210_v13 = vsel %vm1194_vm3, %v1186_v5, %v1202_v9  ;;  %v1384_v9 = vpop.permute.xlu0 %1383  ;;  %1798 = vtanh.f32 %v1486_v11 }
 0x227   : > { %1276 = vmatprep.subr.mxu1 %v1210_v13  ;;  %v1379_v13 = vpop.permute.xlu1 %1378  ;;  %1800 = vtanh.f32 %v1487_v12 }
 0x228   : > { %1277 = vmatpush1.msra.mxu1 %v1209_v17  ;;  %1802 = vtanh.f32 %v1489_v16 }
 0x229   : > { %1278 = vmatprep.subr.mxu1 %v1208_v18 }
 0x22a   : > { %1279 = vmatpush1.msra.mxu1 %v1207_v24  ;;  %v1374_v14 = vpop.permute.xlu0 %1373 }
 0x22b   : > { %1280 = vmatprep.subr.mxu1 %v1206_v26 }
 0x22c   : > { %1281 = vmatpush1.msra.mxu1 %v1205_v27 }
 0x22d   : > { %1282 = vmatprep.subr.mxu1 %v1204_v28 }
 0x22e   : > { %1283 = vmatpush1.msra.mxu1 %v1203_v31  ;;  %v1795_v31 = vpop.eup %1794 }
 0x22f   : > { %1712 = vmatmul.mubr.msk.f32.vlgmr.msra.gmra.mxu1 %vm1239_vm11, %v1211_v29 }
 0x230   : > { %1322 = vmatprep.mubr.f32.mxu1 %v1880_v6 }
 0x233   : > { %1713 = vmatmul.mubr.msk.f32.gmra.mxu1 %vm1239_vm11, %v1212_v32  ;;  %v1797_v32 = vpop.eup %1796 }
 0x234   : > { %1328 = vmatprep.mubr.f32.mxu1 %v1880_v6 }
 0x237   : > { %1714 = vmatmul.mubr.msk.f32.gmra.mxu1 %vm1239_vm11, %v1213_v33  ;;  %v1799_v33 = vpop.eup %1798 }
 0x238   : > { %1334 = vmatprep.mubr.f32.mxu1 %v1880_v6 }
 0x23b   : > { %1715 = vmatmul.mubr.msk.f32.gmra.mxu1 %vm1239_vm11, %v1214_v34  ;;  %v1801_v34 = vpop.eup %1800 }
 0x2ef   : > { %v1318_v25 = vpop.f32.mrf.mxu1 }
 0x2f0   : > { %v1319_v54 = vadd.f32 %v1318_v25, %v1222_v47  ;;  %v1803_v25 = vpop.eup %1802 }
 0x2f1   : > { %v1320_v21 = vpop.f32.mrf.mxu1 }
 0x2f2   : > { %v1321_v50 = vadd.f32 %v1320_v21, %v1222_v47  ;;  %v1349_v60 = vmul.f32 0.01, %v1319_v54  ;;  %vm1341_vm3 = vcmp.ge.f32.partialorder %v1319_v54, 0.0  ;;  %v1502_v47 = vld [vmem:[%s2250_s3] sm:$0x7] }
 0x2f3   : > { %v1324_v35 = vpop.f32.mrf.mxu1 }
 0x2f4   : > { %v1325_v51 = vadd.f32 %v1324_v35, %v1227_v44  ;;  %v1350_v58 = vmul.f32 0.01, %v1321_v50  ;;  %vm1342_vm2 = vcmp.ge.f32.partialorder %v1321_v50, 0.0  ;;  %v1357_v3 = vsel %vm1341_vm3, %v1319_v54, %v1349_v60 }
 0x2f5   : > { %v1326_v36 = vpop.f32.mrf.mxu1 }
 0x2f6   : > { %v1327_v48 = vadd.f32 %v1326_v36, %v1227_v44  ;;  %v1351_v22 = vmul.f32 0.01, %v1325_v51  ;;  %vm1343_vm1 = vcmp.ge.f32.partialorder %v1325_v51, 0.0  ;;  %v1358_v1 = vsel %vm1342_vm2, %v1321_v50, %v1350_v58 }
 0x2f7   : > { %v1330_v38 = vpop.f32.mrf.mxu1 }
 0x2f8   : > { %v1331_v45 = vadd.f32 %v1330_v38, %v1232_v39  ;;  %v1352_v56 = vmul.f32 0.01, %v1327_v48  ;;  %vm1344_vm0 = vcmp.ge.f32.partialorder %v1327_v48, 0.0  ;;  %v1359_v0 = vsel %vm1343_vm1, %v1325_v51, %v1351_v22 }
 0x2f9   : > { %v1332_v41 = vpop.f32.mrf.mxu1 }
 0x2fa   : > { %v1333_v23 = vadd.f32 %v1332_v41, %v1232_v39  ;;  %v1353_v55 = vmul.f32 0.01, %v1331_v45  ;;  %vm1345_vm15 = vcmp.ge.f32.partialorder %v1331_v45, 0.0  ;;  %v1360_v63 = vsel %vm1344_vm0, %v1327_v48, %v1352_v56 }
 0x2fb   : > { %v1336_v20 = vpop.f32.mrf.mxu1 }
 0x2fc   : > { %v1337_v43 = vadd.f32 %v1336_v20, %v1237_v37  ;;  %v1354_v52 = vmul.f32 0.01, %v1333_v23  ;;  %vm1346_vm14 = vcmp.ge.f32.partialorder %v1333_v23, 0.0  ;;  %v1361_v62 = vsel %vm1345_vm15, %v1331_v45, %v1353_v55 }
 0x2fd   : > { %v1338_v46 = vpop.f32.mrf.mxu1 }
 0x2fe   : > { %v1339_v49 = vadd.f32 %v1338_v46, %v1237_v37  ;;  %v1355_v40 = vmul.f32 0.01, %v1337_v43  ;;  %vm1347_vm12 = vcmp.ge.f32.partialorder %v1337_v43, 0.0  ;;  %v1362_v59 = vsel %vm1346_vm14, %v1333_v23, %v1354_v52 }
 0x300   : > { %v1356_v53 = vmul.f32 0.01, %v1339_v49  ;;  %vm1348_vm13 = vcmp.ge.f32.partialorder %v1339_v49, 0.0  ;;  %v1363_v42 = vsel %vm1347_vm12, %v1337_v43, %v1355_v40 }
 0x302   : > { %v1364_v57 = vsel %vm1348_vm13, %v1339_v49, %v1356_v53 }
 0x303   : > { %1419 = vmatprep.subr.mxu0 %v1364_v57 }
 0x304   : > { %1420 = vmatpush1.msra.mxu0 %v1363_v42 }
 0x305   : > { %1421 = vmatprep.subr.mxu0 %v1362_v59 }
 0x306   : > { %1422 = vmatpush1.msra.mxu0 %v1361_v62 }
 0x307   : > { %1423 = vmatprep.subr.mxu0 %v1360_v63 }
 0x308   : > { %1424 = vmatpush1.msra.mxu0 %v1359_v0 }
 0x309   : > { %1425 = vmatprep.subr.mxu0 %v1358_v1 }
 0x30a   : > { %1426 = vmatpush1.msra.mxu0 %v1357_v3 }
 0x30b   : > { %1716 = vmatmul.mubr.msk.f32.vlgmr.msra.gmra.mxu0 %vm1239_vm11, %v1365_v2 }
 0x30c   : > { %1465 = vmatprep.mubr.f32.mxu0 %v1880_v6 }
 0x30f   : > { %1717 = vmatmul.mubr.msk.f32.gmra.mxu0 %vm1239_vm11, %v1366_v30 }
 0x310   : > { %1471 = vmatprep.mubr.f32.mxu0 %v1880_v6 }
 0x313   : > { %1718 = vmatmul.mubr.msk.f32.gmra.mxu0 %vm1239_vm11, %v1367_v4 }
 0x314   : > { %1571 = vmatprep.mubr.f32.mxu0 %v1880_v6  ;;  %v1488_v6 = vld [vmem:[%s389_s24 + $0x20] sm:$0xff]  ;;  %s1596_s24 = scalar_lea.hbm %s2258_s11, %s1726_s12 }
 0x315   : > { %1804 = vtanh.f32 %v1488_v6 }
 0x322   : > { %v1805_v21 = vpop.eup %1804 }
 0x3cb   : > { %v1461_v5 = vpop.f32.mrf.mxu0 }
 0x3cc   : > { %v1462_v29 = vadd.f32 %v1461_v5, %v1374_v14 }
 0x3cd   : > { %v1463_v7 = vpop.f32.mrf.mxu0 }
 0x3ce   : > { %v1464_v27 = vadd.f32 %v1463_v7, %v1374_v14 }
 0x3cf   : > { %v1467_v10 = vpop.f32.mrf.mxu0 }
 0x3d0   : > { %v1468_v24 = vadd.f32 %v1467_v10, %v1379_v13 }
 0x3d1   : > { %v1469_v15 = vpop.f32.mrf.mxu0 }
 0x3d2   : > { %v1470_v17 = vadd.f32 %v1469_v15, %v1379_v13 }
 0x3d3   : > { %v1473_v18 = vpop.f32.mrf.mxu0 }
 0x3d4   : > { %v1474_v19 = vadd.f32 %v1473_v18, %v1384_v9  ;;  %1806 = vtanh.f32 %v1470_v17 }
 0x3d5   : > { %v1475_v26 = vpop.f32.mrf.mxu0 }
 0x3d6   : > { %v1476_v28 = vadd.f32 %v1475_v26, %v1384_v9  ;;  %1808 = vtanh.f32 %v1474_v19 }
 0x3d8   : > { %1810 = vtanh.f32 %v1476_v28 }
 0x3d9   : > { %1812 = vtanh.f32 %v1468_v24 }
 0x3da   : > { %1814 = vtanh.f32 %v1464_v27 }
 0x3db   : > { %1816 = vtanh.f32 %v1462_v29 }
 0x3e1   : > { %v1807_v35 = vpop.eup %1806 }
 0x3e2   : > { %v1499_v43 = vmul.f32 %v1807_v35, %v1801_v34 }
 0x3e3   : > { %v1809_v36 = vpop.eup %1808 }
 0x3e4   : > { %v1500_v20 = vmul.f32 %v1809_v36, %v1805_v21 }
 0x3e5   : > { %v1811_v37 = vpop.eup %1810 }
 0x3e6   : > { %v1813_v38 = vpop.eup %1812  ;;  %v1501_v39 = vmul.f32 %v1811_v37, %v1803_v25 }
 0x3e7   : > { %v1815_v41 = vpop.eup %1814  ;;  %v1498_v44 = vmul.f32 %v1813_v38, %v1799_v33 }
 0x3e8   : > { %v1817_v23 = vpop.eup %1816  ;;  %1533 = vmatprep.subr.mxu0 %v1501_v39  ;;  %v1497_v45 = vmul.f32 %v1815_v41, %v1797_v32 }
 0x3e9   : > { %1534 = vmatpush1.msra.mxu0 %v1500_v20  ;;  %v1496_v46 = vmul.f32 %v1817_v23, %v1795_v31 }
 0x3ea   : > { %1535 = vmatprep.subr.mxu0 %v1499_v43 }
 0x3eb   : > { %1536 = vmatpush1.msra.mxu0 %v1498_v44 }
 0x3ec   : > { %1537 = vmatprep.subr.mxu0 %v1497_v45 }
 0x3ed   : > { %1538 = vmatpush1.msra.mxu0 %v1496_v46 }
 0x3ee   : > { %1719 = vmatmul.mubr.msk.f32.vlgmr.msra.gmra.mxu0 %vm1503_vm4, %v1502_v47 }
 0x4ae   : > { %v1573_v48 = vpop.f32.mrf.mxu0 }
 0x4b0   : > { %v1575_v49 = vpop.f32.mrf.mxu0 }
 0x4b1   : > { %v1580_v50 = vcombine.low %v1573_v48, %v1575_v49 }
 0x4b3   : > { %1582 = vst [vmem:[%s430_s13] sm:$0x77] %v1580_v50 }
 0x4b4   : > { %1831 = shalt.err (!%p1828_p7)
}
 0x4b5   : > { %s1832_s30 = scalar_lea.hbm %s1596_s24, 128  ;;  %s1836_s13 = scalar_lea.hbm %s2258_s11, 256 }
 0x4b6   : > { %p1833_p10 = scmp.ne.s32.totalorder %s1596_s24, %s1832_s30  ;;  %p1837_p13 = scmp.lt.s32.totalorder %s1596_s24, %s2258_s11 }
 0x4b7   : > { %p1838_p0 = scmp.lt.s32.totalorder %s1836_s13, %s1832_s30 }
 0x4b8   : > { %p1834_p11 = pnand %p1833_p10, %p1988_p6 }
 0x4b9   : > { %p1839_p1 = por %p1838_p0, %p1837_p13 }
 0x4ba   : > { %p1835_p12 = pneg %p1834_p11 }
 0x4bc   : > { %p1840_p9 = pnand %p1839_p1, %p1835_p12 }
 0x4be   : > { %1843 = shalt.err (!%p1840_p9)
}
 0x4bf   : > { %1737 = dma.vmem_to_hbm [thread:$0]  (%p1988_p6), %s1599_s14, 128, %s1596_s24, %s1584_s25  }
 0x4c0 PF: > { %s1610_s0 = sand.u32 1, %s1866_s17   ;;  %p2268_p2 = scmp.ge.s32.totalorder %s1878_s20, 2 }
 0x4c1   : > { %s1611_s1 = scalar_lea.sflag [#allocation4], %s1610_s0 }
 0x4c2   : > { %p1740_p3 = pnand %p2268_p2, %p1992_p8 }
 0x4c4   : > { %p1741_p4 = pneg %p1740_p3 }
 0x4c6   : > { %1861 = dma.done.wait (%p1741_p4), %s1611_s1, 128  }
 0x4c7   : > { %1863 = vsyncadd (%p1741_p4), %s1611_s1, 4294967168  ;;  %p21_p9 = scmp.ge.s32.totalorder %s1974_s23, 4   ;;  %s2269_s17 = smov %s1870_s18 }
 0x4c8   : > { %s2270_s18 = smov %s1874_s19  ;;  %s2271_s19 = smov %s1986_s26 }
 0x4c9   : > { %s2272_s20 = smov %s1974_s23  ;;  %23 = sbr.rel (!%p21_p9) target bundleno = 6 (0x6), region = 130 }
 0x4ce   :  { %1616 = vsyncpa [#allocation4], 1 }
 0x4cf   :  { %1618 = vsyncpa [#allocation4 + $0x1], 1 }

</bundles_post_ra>
